<compile_context>
chip_gen: v6e
topology: v6e:2x2x1
jax: 0.10.0
libtpu: 0.0.40
codegen_flags: <defaults>
</compile_context>

<pallas_src>
import functools

import jax
import jax.numpy as jnp
from jax.experimental import pallas as pl
from jax.experimental.pallas import tpu as pltpu


def _round_up(x, m):
    return ((x + m - 1) // m) * m


def _focal_loss_kernel(x_ref, tgt_ref, wt_ref, num_ref, den_ref,
                       num_acc, den_acc, *, gamma):
    # x_ref:   [T, C] logits tile (native dtype)
    # tgt_ref: [T, 1] int32 class indices
    # wt_ref:  [T, 1] f32 per-row class weight (0.0 on padded rows)
    # num_ref/den_ref: [1, 1, 1] f32 per-chunk partial outputs
    # num_acc/den_acc: [T, 1] f32 VMEM per-row accumulators (persist across
    #                  the inner grid axis)
    i = pl.program_id(1)

    @pl.when(i == 0)
    def _():
        num_acc[...] = jnp.zeros_like(num_acc)
        den_acc[...] = jnp.zeros_like(den_acc)

    x = x_ref[...].astype(jnp.float32)            # [T, C]
    tgt = tgt_ref[...]                            # [T, 1] int32
    wt = wt_ref[...]                              # [T, 1] f32
    t, c = x.shape

    # Row-wise log-sum-exp pieces: the only full-tile work left is one exp and
    # three cross-lane reductions (max, sum_exp, zt).
    m = jnp.max(x, axis=1, keepdims=True)                       # [T, 1]
    z = x - m                                                   # [T, C]
    sum_exp = jnp.sum(jnp.exp(z), axis=1, keepdims=True)        # [T, 1]

    # Gather z at the target column without materializing an f32 one-hot.
    col = jax.lax.broadcasted_iota(jnp.int32, (t, c), 1)
    zt = jnp.sum(jnp.where(col == tgt, z, 0.0), axis=1, keepdims=True)  # [T, 1]

    # Per-row [T, 1] scalars from here on; log/exp ride the EUP slot.
    logpt_t = zt - jnp.log(sum_exp)               # log_softmax at target
    pt_t = jnp.exp(logpt_t)                       # softmax at target
    one_minus = jnp.maximum(1.0 - pt_t, 0.0)      # exp rounding can push pt > 1

    g = float(gamma)
    if g == 0.0:
        mod = jnp.ones_like(one_minus)
    elif g == 1.0:
        mod = one_minus
    elif g == 2.0:
        mod = one_minus * one_minus
    elif g == int(g) and 0.0 < g <= 8.0:
        mod = one_minus
        for _ in range(int(g) - 1):
            mod = mod * one_minus
    else:
        # Generic (fractional) gamma: pow only on [T, 1] gathered values.
        mod = jnp.power(one_minus, g)

    focal_t = mod * logpt_t                       # (1-pt)^g * logpt at target

    # Padded rows carry wt == 0, so they vanish from num and den with no
    # explicit masking. Per-row accumulation: no cross-sublane reduce in the
    # hot loop.
    num_acc[...] += -wt * focal_t
    den_acc[...] += wt

    @pl.when(i == pl.num_programs(1) - 1)
    def _():
        num_ref[...] = jnp.sum(num_acc[...], axis=0, keepdims=True).reshape(1, 1, 1)
        den_ref[...] = jnp.sum(den_acc[...], axis=0, keepdims=True).reshape(1, 1, 1)


def focal_loss(logits, target, gamma=2.0, weight=None, tile_n=None):
    """logits: [N, C] float (any float dtype), target: [N] int,
    weight: optional [C] float per-class rescaling weights."""
    n, c = logits.shape
    itemsize = jnp.dtype(logits.dtype).itemsize

    # Generation-aware VMEM budget: ~64 MiB/TC on v7x, 128 MiB on v5e/v6e.
    try:
        vmem_cap = int(pltpu.get_tpu_info().vmem_capacity_bytes)
    except Exception:
        vmem_cap = 64 * 1024 * 1024  # conservative fallback (valid on all gens)
    vmem_limit = int(max(16 << 20, min(vmem_cap - (12 << 20), 120 << 20)))

    # Tile size derived from C, dtype and the VMEM budget:
    #   per-row cost ~ C * (2*itemsize double-buffered input + ~3 live f32
    #   [T, C] intermediates) plus small [T, 1] extras.
    if tile_n is None:
        per_row_bytes = c * (2 * itemsize + 3 * 4) + 64
        tile_n = (vmem_limit - (4 << 20)) // per_row_bytes
        tile_n = max(128, min(2048, int(tile_n)))
    tile_n = min(int(tile_n), max(8, _round_up(n, 8)))   # don't over-pad tiny N
    tile_n = max(8, (tile_n // 8) * 8)

    # Leading parallel axis: shard row-chunks across TensorCores (2 on v7x).
    tiles_total = -(-n // tile_n)
    num_chunks = 2 if tiles_total >= 2 else 1
    tiles_per_chunk = -(-tiles_total // num_chunks)
    n_pad = num_chunks * tiles_per_chunk * tile_n

    # Wrapper-side per-row weight gather (tiny XLA gather). Padded rows get
    # weight 0.0, which masks them out of numerator and denominator for free.
    if weight is None:
        wt = jnp.ones((n,), dtype=jnp.float32)
    else:
        wt = weight.astype(jnp.float32)[target]
    wt2d = wt.reshape(n, 1)
    tgt2d = target.astype(jnp.int32).reshape(n, 1)
    x = logits                                   # keep native dtype in HBM
    if n_pad != n:
        x = jnp.pad(x, ((0, n_pad - n), (0, 0)))
        tgt2d = jnp.pad(tgt2d, ((0, n_pad - n), (0, 0)))
        wt2d = jnp.pad(wt2d, ((0, n_pad - n), (0, 0)))

    kernel = functools.partial(_focal_loss_kernel, gamma=float(gamma))

    cost = pl.CostEstimate(
        flops=int(6 * n * c + 12 * n),
        transcendentals=int(n * c + 2 * n),
        bytes_accessed=int(n_pad * c * itemsize + n_pad * 8 + 2 * num_chunks * 4),
    )

    tpc = tiles_per_chunk  # Python int closed over by the index maps

    num_part, den_part = pl.pallas_call(
        kernel,
        out_shape=(jax.ShapeDtypeStruct((num_chunks, 1, 1), jnp.float32),
                   jax.ShapeDtypeStruct((num_chunks, 1, 1), jnp.float32)),
        grid=(num_chunks, tiles_per_chunk),
        in_specs=[
            pl.BlockSpec((tile_n, c), lambda g, i: (g * tpc + i, 0)),  # logits
            pl.BlockSpec((tile_n, 1), lambda g, i: (g * tpc + i, 0)),  # targets
            pl.BlockSpec((tile_n, 1), lambda g, i: (g * tpc + i, 0)),  # row weights
        ],
        out_specs=(
            pl.BlockSpec((1, 1, 1), lambda g, i: (g, 0, 0)),
            pl.BlockSpec((1, 1, 1), lambda g, i: (g, 0, 0)),
        ),
        scratch_shapes=[
            pltpu.VMEM((tile_n, 1), jnp.float32),  # per-row num accumulator
            pltpu.VMEM((tile_n, 1), jnp.float32),  # per-row den accumulator
        ],
        compiler_params=pltpu.CompilerParams(
            dimension_semantics=("parallel", "arbitrary"),
            vmem_limit_bytes=vmem_limit,
        ),
        cost_estimate=cost,
    )(x, tgt2d, wt2d)

    return jnp.sum(num_part) / jnp.sum(den_part)


def _focal_loss_ref(logits, target, gamma=2.0, weight=None):
    """Pure-JAX reference matching the PyTorch module."""
    n, c = logits.shape
    if weight is None:
        weight = jnp.ones((c,), dtype=jnp.float32)
    logpt = jax.nn.log_softmax(logits.astype(jnp.float32), axis=1)
    pt = jnp.exp(logpt)
    logpt = (1.0 - pt) ** gamma * logpt
    picked = jnp.take_along_axis(logpt, target[:, None], axis=1)[:, 0]
    wt = weight.astype(jnp.float32)[target]
    return jnp.sum(-wt * picked) / jnp.sum(wt)


if __name__ == "__main__":
    key = jax.random.PRNGKey(0)
    k_x, k_t, k_w, k_x2, k_t2 = jax.random.split(key, 5)

    # Small shapes consistent with the module: input [N, C], target [N].
    N, C = 8, 16
    logits = jax.random.normal(k_x, (N, C), dtype=jnp.float32)
    target = jax.random.randint(k_t, (N,), 0, C, dtype=jnp.int32)
    class_weight = 0.5 + jax.random.uniform(k_w, (C,), dtype=jnp.float32)

    loss = jax.block_until_ready(focal_loss(logits, target, gamma=2.0,
                                            weight=class_weight))
    ref = _focal_loss_ref(logits, target, gamma=2.0, weight=class_weight)
    assert jnp.allclose(loss, ref, atol=1e-5, rtol=1e-5), (loss, ref)

    # weight=None path (plain mean).
    loss_nw = jax.block_until_ready(focal_loss(logits, target, gamma=2.0))
    ref_nw = _focal_loss_ref(logits, target, gamma=2.0)
    assert jnp.allclose(loss_nw, ref_nw, atol=1e-5, rtol=1e-5), (loss_nw, ref_nw)

    # Multi-tile, multi-chunk grid + padded rows (N not a multiple of tile_n);
    # exercises the parallel leading axis and zero-weight padding path.
    N2, C2 = 37, 24
    logits2 = jax.random.normal(k_x2, (N2, C2), dtype=jnp.float32)
    target2 = jax.random.randint(k_t2, (N2,), 0, C2, dtype=jnp.int32)
    loss2 = jax.block_until_ready(focal_loss(logits2, target2, gamma=2.0,
                                             tile_n=16))
    ref2 = _focal_loss_ref(logits2, target2, gamma=2.0)
    assert jnp.allclose(loss2, ref2, atol=1e-5, rtol=1e-5), (loss2, ref2)

    print("KERNEL_OK")
</pallas_src>

<mosaic_0001>
module attributes {stable_mosaic.version = 11 : i64} {
  func.func @_focal_loss_kernel(%arg0: i32, %arg1: i32, %arg2: memref<8x16xf32, #tpu.memory_space<vmem>>, %arg3: memref<8x1xi32, #tpu.memory_space<vmem>>, %arg4: memref<8x1xf32, #tpu.memory_space<vmem>>, %arg5: memref<1x1x1xf32, #tpu.memory_space<vmem>>, %arg6: memref<1x1x1xf32, #tpu.memory_space<vmem>>, %arg7: memref<8x1xf32, #tpu.memory_space<vmem>>, %arg8: memref<8x1xf32, #tpu.memory_space<vmem>>) attributes {dimension_semantics = [#tpu.dimension_semantics<parallel>, #tpu.dimension_semantics<arbitrary>], iteration_bounds = array<i64: 1, 1>, scalar_prefetch = 0 : i64, scratch_operands = 2 : i64, tpu.core_type = #tpu.core_type<tc>, window_params = [{transform_indices = @transform_0, window_bounds = array<i64: 8, 16>}, {transform_indices = @transform_1, window_bounds = array<i64: 8, 1>}, {transform_indices = @transform_2, window_bounds = array<i64: 8, 1>}, {transform_indices = @transform_3, window_bounds = array<i64: 1, 1, 1>}, {transform_indices = @transform_4, window_bounds = array<i64: 1, 1, 1>}]} {
    %c0_i32 = arith.constant 0 : i32
    %0 = arith.cmpi eq, %arg1, %c0_i32 : i32
    %1 = arith.extui %0 : i1 to i32
    %c0_i32_0 = arith.constant 0 : i32
    %2 = arith.cmpi ne, %1, %c0_i32_0 : i32
    scf.if %2 {
      %cst_22 = arith.constant 0.000000e+00 : f32
      %41 = vector.broadcast %cst_22 : f32 to vector<8x1xf32>
      %c0_23 = arith.constant 0 : index
      %c0_24 = arith.constant 0 : index
      %42 = vector.load %arg7[%c0_23, %c0_24] : memref<8x1xf32, #tpu.memory_space<vmem>>, vector<8x1xf32>
      tpu.vector_store %arg7[%c0_23, %c0_24], %41 {strides = array<i32>} : memref<8x1xf32, #tpu.memory_space<vmem>>, vector<8x1xf32>,
      %cst_25 = arith.constant 0.000000e+00 : f32
      %43 = vector.broadcast %cst_25 : f32 to vector<8x1xf32>
      %c0_26 = arith.constant 0 : index
      %c0_27 = arith.constant 0 : index
      %44 = vector.load %arg8[%c0_26, %c0_27] : memref<8x1xf32, #tpu.memory_space<vmem>>, vector<8x1xf32>
      tpu.vector_store %arg8[%c0_26, %c0_27], %43 {strides = array<i32>} : memref<8x1xf32, #tpu.memory_space<vmem>>, vector<8x1xf32>,
    } else {
    }
    %c0 = arith.constant 0 : index
    %c0_1 = arith.constant 0 : index
    %3 = vector.load %arg2[%c0, %c0_1] : memref<8x16xf32, #tpu.memory_space<vmem>>, vector<8x16xf32>
    %c0_2 = arith.constant 0 : index
    %c0_3 = arith.constant 0 : index
    %4 = vector.load %arg3[%c0_2, %c0_3] : memref<8x1xi32, #tpu.memory_space<vmem>>, vector<8x1xi32>
    %c0_4 = arith.constant 0 : index
    %c0_5 = arith.constant 0 : index
    %5 = vector.load %arg4[%c0_4, %c0_5] : memref<8x1xf32, #tpu.memory_space<vmem>>, vector<8x1xf32>
    %cst = arith.constant dense<0xFF800000> : vector<8xf32>
    %6 = vector.multi_reduction <maximumf>, %3, %cst [1] : vector<8x16xf32> to vector<8xf32>
    %7 = vector.shape_cast %6 : vector<8xf32> to vector<8x1xf32>
    %8 = vector.broadcast %7 : vector<8x1xf32> to vector<8x16xf32>
    %9 = arith.subf %3, %8 : vector<8x16xf32>
    %10 = math.exp %9 : vector<8x16xf32>
    %cst_6 = arith.constant dense<0.000000e+00> : vector<8xf32>
    %11 = vector.multi_reduction <add>, %10, %cst_6 [1] : vector<8x16xf32> to vector<8xf32>
    %12 = vector.shape_cast %11 : vector<8xf32> to vector<8x1xf32>
    %13 = tpu.iota {dimensions = array<i32: 1>} : vector<8x16xi32>
    %14 = vector.broadcast %4 : vector<8x1xi32> to vector<8x16xi32>
    %15 = arith.cmpi eq, %13, %14 : vector<8x16xi32>
    %cst_7 = arith.constant 0.000000e+00 : f32
    %16 = vector.broadcast %cst_7 : f32 to vector<8x16xf32>
    %17 = arith.select %15, %9, %16 : vector<8x16xi1>, vector<8x16xf32>
    %cst_8 = arith.constant dense<0.000000e+00> : vector<8xf32>
    %18 = vector.multi_reduction <add>, %17, %cst_8 [1] : vector<8x16xf32> to vector<8xf32>
    %19 = vector.shape_cast %18 : vector<8xf32> to vector<8x1xf32>
    %20 = math.log %12 : vector<8x1xf32>
    %21 = arith.subf %19, %20 : vector<8x1xf32>
    %22 = math.exp %21 : vector<8x1xf32>
    %cst_9 = arith.constant 1.000000e+00 : f32
    %23 = vector.broadcast %cst_9 : f32 to vector<8x1xf32>
    %24 = arith.subf %23, %22 : vector<8x1xf32>
    %cst_10 = arith.constant 0.000000e+00 : f32
    %25 = vector.broadcast %cst_10 : f32 to vector<8x1xf32>
    %26 = arith.maximumf %24, %25 : vector<8x1xf32>
    %27 = arith.mulf %26, %26 : vector<8x1xf32>
    %28 = arith.mulf %27, %21 : vector<8x1xf32>
    %c0_11 = arith.constant 0 : index
    %c0_12 = arith.constant 0 : index
    %29 = vector.load %arg7[%c0_11, %c0_12] : memref<8x1xf32, #tpu.memory_space<vmem>>, vector<8x1xf32>
    %cst_13 = arith.constant 0.000000e+00 : f32
    %30 = vector.broadcast %cst_13 : f32 to vector<8x1xf32>
    %31 = arith.subf %30, %5 : vector<8x1xf32>
    %32 = arith.mulf %31, %28 : vector<8x1xf32>
    %33 = arith.addf %29, %32 : vector<8x1xf32>
    %c0_14 = arith.constant 0 : index
    %c0_15 = arith.constant 0 : index
    %34 = vector.load %arg7[%c0_14, %c0_15] : memref<8x1xf32, #tpu.memory_space<vmem>>, vector<8x1xf32>
    tpu.vector_store %arg7[%c0_14, %c0_15], %33 {strides = array<i32>} : memref<8x1xf32, #tpu.memory_space<vmem>>, vector<8x1xf32>,
    %c0_16 = arith.constant 0 : index
    %c0_17 = arith.constant 0 : index
    %35 = vector.load %arg8[%c0_16, %c0_17] : memref<8x1xf32, #tpu.memory_space<vmem>>, vector<8x1xf32>
    %36 = arith.addf %35, %5 : vector<8x1xf32>
    %c0_18 = arith.constant 0 : index
    %c0_19 = arith.constant 0 : index
    %37 = vector.load %arg8[%c0_18, %c0_19] : memref<8x1xf32, #tpu.memory_space<vmem>>, vector<8x1xf32>
    tpu.vector_store %arg8[%c0_18, %c0_19], %36 {strides = array<i32>} : memref<8x1xf32, #tpu.memory_space<vmem>>, vector<8x1xf32>,
    %c0_i32_20 = arith.constant 0 : i32
    %38 = arith.cmpi eq, %arg1, %c0_i32_20 : i32
    %39 = arith.extui %38 : i1 to i32
    %c0_i32_21 = arith.constant 0 : i32
    %40 = arith.cmpi ne, %39, %c0_i32_21 : i32
    scf.if %40 {
      %c0_22 = arith.constant 0 : index
      %c0_23 = arith.constant 0 : index
      %41 = vector.load %arg7[%c0_22, %c0_23] : memref<8x1xf32, #tpu.memory_space<vmem>>, vector<8x1xf32>
      %cst_24 = arith.constant dense<0.000000e+00> : vector<1xf32>
      %42 = vector.multi_reduction <add>, %41, %cst_24 [0] : vector<8x1xf32> to vector<1xf32>
      %43 = vector.shape_cast %42 : vector<1xf32> to vector<1x1xf32>
      %44 = vector.shape_cast %43 : vector<1x1xf32> to vector<1x1x1xf32>
      %c0_25 = arith.constant 0 : index
      %c0_26 = arith.constant 0 : index
      %c0_27 = arith.constant 0 : index
      %45 = vector.load %arg5[%c0_25, %c0_26, %c0_27] : memref<1x1x1xf32, #tpu.memory_space<vmem>>, vector<1x1x1xf32>
      tpu.vector_store %arg5[%c0_25, %c0_26, %c0_27], %44 {strides = array<i32>} : memref<1x1x1xf32, #tpu.memory_space<vmem>>, vector<1x1x1xf32>,
      %c0_28 = arith.constant 0 : index
      %c0_29 = arith.constant 0 : index
      %46 = vector.load %arg8[%c0_28, %c0_29] : memref<8x1xf32, #tpu.memory_space<vmem>>, vector<8x1xf32>
      %cst_30 = arith.constant dense<0.000000e+00> : vector<1xf32>
      %47 = vector.multi_reduction <add>, %46, %cst_30 [0] : vector<8x1xf32> to vector<1xf32>
      %48 = vector.shape_cast %47 : vector<1xf32> to vector<1x1xf32>
      %49 = vector.shape_cast %48 : vector<1x1xf32> to vector<1x1x1xf32>
      %c0_31 = arith.constant 0 : index
      %c0_32 = arith.constant 0 : index
      %c0_33 = arith.constant 0 : index
      %50 = vector.load %arg6[%c0_31, %c0_32, %c0_33] : memref<1x1x1xf32, #tpu.memory_space<vmem>>, vector<1x1x1xf32>
      tpu.vector_store %arg6[%c0_31, %c0_32, %c0_33], %49 {strides = array<i32>} : memref<1x1x1xf32, #tpu.memory_space<vmem>>, vector<1x1x1xf32>,
    } else {
    }
    return
  }
  func.func @transform_0(%arg0: i32, %arg1: i32) -> (i32, i32) {
    %c1_i32 = arith.constant 1 : i32
    %0 = arith.muli %arg0, %c1_i32 : i32
    %1 = arith.addi %0, %arg1 : i32
    %c0_i32 = arith.constant 0 : i32
    %c0_i32_0 = arith.constant 0 : i32
    return %1, %c0_i32 : i32, i32
  }
  func.func @transform_1(%arg0: i32, %arg1: i32) -> (i32, i32) {
    %c1_i32 = arith.constant 1 : i32
    %0 = arith.muli %arg0, %c1_i32 : i32
    %1 = arith.addi %0, %arg1 : i32
    %c0_i32 = arith.constant 0 : i32
    %c0_i32_0 = arith.constant 0 : i32
    return %1, %c0_i32 : i32, i32
  }
  func.func @transform_2(%arg0: i32, %arg1: i32) -> (i32, i32) {
    %c1_i32 = arith.constant 1 : i32
    %0 = arith.muli %arg0, %c1_i32 : i32
    %1 = arith.addi %0, %arg1 : i32
    %c0_i32 = arith.constant 0 : i32
    %c0_i32_0 = arith.constant 0 : i32
    return %1, %c0_i32 : i32, i32
  }
  func.func @transform_3(%arg0: i32, %arg1: i32) -> (i32, i32, i32) {
    %c0_i32 = arith.constant 0 : i32
    %c0_i32_0 = arith.constant 0 : i32
    %c0_i32_1 = arith.constant 0 : i32
    return %arg0, %c0_i32, %c0_i32_0 : i32, i32, i32
  }
  func.func @transform_4(%arg0: i32, %arg1: i32) -> (i32, i32, i32) {
    %c0_i32 = arith.constant 0 : i32
    %c0_i32_0 = arith.constant 0 : i32
    %c0_i32_1 = arith.constant 0 : i32
    return %arg0, %c0_i32, %c0_i32_0 : i32, i32, i32
  }
}

</mosaic_0001>

<bundles_post_ra>
// kernel: tpu_custom_call.1
= control target key start
LH: loop header
LB: loop body
LE: loop exit
PB: predicated region body
PF: predicated region fallthrough
CT: control target
= control target key end

     0   :  { %10 = vsyncpa [#allocation5], 0  ;;  %vm79_vm0 = vcmask 130048   ;;  %s295_s0 = inlined_call_operand.vmem [shape: f32[8,16], index: 0, kind: input, shape index: {}]   ;;  %s296_s1 = inlined_call_operand.vmem [shape: s32[8,1], index: 1, kind: input, shape index: {}]   ;;  %s297_s2 = inlined_call_operand.vmem [shape: f32[8,1], index: 2, kind: input, shape index: {}]   ;;  %s298_s3 = inlined_call_operand.hbm [shape: f32[1,1,1], index: 3, kind: output, shape index: {0}]   ;;  %s299_s4 = inlined_call_operand.hbm [shape: f32[1,1,1], index: 4, kind: output, shape index: {1}]  }
   0x1   :  { %v76_v0 = vld [vmem:[%s295_s0] sm:$0xff] }
   0x2   :  { %11 = vsyncpa [#allocation7], 0  ;;  %v80_v1 = vsel %vm79_vm0, %v76_v0, -inf  ;;  %v240_v2 = vmov 0   ;;  %v77_v3 = vld [vmem:[%s296_s1] sm:$0xff]  ;;  %v89_v7 = vlaneseq  ;;  %vm73_vm2 = vcmask 7168  }
   0x3   :  { %189 = vset.pattern.permute.xlu0 %v240_v2  ;;  %v241_v14 = vmov 0.0   ;;  %v78_v15 = vld [vmem:[%s297_s2] sm:$0xff]  ;;  %vm128_vm3 = vcmask 0   ;;  %s242_s19 = smov [#allocation6]  }
   0x4   :  { %81 = vmax.xlane.f32.xlu0 %v80_v1  ;;  %v90_v8 = vand.u32 127, %v89_v7  ;;  %74 = vst.msk [vmem:[#allocation2] sm:$0xff] %vm73_vm2, %v241_v14  ;;  %75 = vst.msk [vmem:[#allocation3] sm:$0xff] %vm73_vm2, %v241_v14  ;;  %s155_s20 = sshll.u32 %s242_s19, 4  ;;  %s156_s20 = int_to_ptr.vmem [resolvable:$true] %s155_s20 }
   0x5   :  { %s196_s2 = scalar_lea.vmem %s156_s20, 16  ;;  %s200_s21 = scalar_lea.vmem %s156_s20, 32 }
   0x6   :  { %p197_p0 = scmp.ne.s32.totalorder %s156_s20, %s196_s2  ;;  %p201_p1 = scmp.lt.s32.totalorder %s156_s20, %s156_s20 }
   0x7   :  { %p202_p2 = scmp.lt.s32.totalorder %s200_s21, %s196_s2 }
   0x9   :  { %p203_p3 = por %p202_p2, %p201_p1 }
   0xb   :  { %v114_v16 = vld [vmem:[#allocation3] sm:$0xff]  ;;  %p204_p4 = pnand %p203_p3, %p197_p0 }
   0xc   :  { %v115_v17 = vadd.f32 %v114_v16, %v78_v15 }
   0xe   :  { %116 = vst.msk [vmem:[#allocation3] sm:$0xff] %vm73_vm2, %v115_v17 }
  0x15   :  { %v130_v18 = vld [vmem:[#allocation3] sm:$0xff] }
  0x16   :  { %v131_v19 = vsel %vm73_vm2, %v130_v18, 0.0 }
  0x17   :  { %v132_v20 = vrot.slane %v131_v19, 4 }
  0x19   :  { %v133_v21 = vadd.f32 %v132_v20, %v131_v19 }
  0x1a   :  { %92 = vperm.xlu0 %189, %v77_v3  }
  0x1b   :  { %v134_v22 = vrot.slane %v133_v21, 2 }
  0x1d   :  { %v135_v23 = vadd.f32 %v134_v22, %v133_v21 }
  0x1f   :  { %v136_v24 = vrot.slane %v135_v23, 1 }
  0x21   :  { %v137_v25 = vadd.f32 %v136_v24, %v135_v23 }
  0x23   :  { %138 = vst.msk [vmem:[#allocation6] sm:$0x1] %vm128_vm3, %v137_v25 }
  0x8d   :  { %v82_v4 = vpop.xlane.xlu0 %81 }
  0x8e   :  { %v83_v5 = vsub.f32 %v76_v0, %v82_v4 }
  0x90   :  { %v84_v6 = vmul.f32 1.442695, %v83_v5 }
  0x92   :  { %190 = vpow2.f32 %v84_v6 }
  0x95   :  { %v93_v9 = vpop.permute.xlu0 %92 }
  0x96   :  { %vm94_vm1 = vcmp.eq.s32.totalorder %v90_v8, %v93_v9 }
  0x97   :  { %v95_v12 = vsel %vm94_vm1, %v83_v5, 0.0 }
  0x98   :  { %v96_v13 = vsel %vm79_vm0, %v95_v12, 0.0 }
  0x9f   :  { %v191_v10 = vpop.eup %190 }
  0xa0   :  { %v86_v11 = vsel %vm79_vm0, %v191_v10, 0.0 }
  0xa1   :  { %87 = vadd.xlane.f32.xlu1 %v86_v11 }
  0xa5   :  { %97 = vadd.xlane.f32.xlu1 %v96_v13 }
  0xa6   :  { %207 = shalt.err (!%p204_p4)
}
  0xa7   :  { %158 = dma.vmem_to_hbm [thread:$0]  %s156_s20, 16, %s299_s4, [#allocation7]   ;;  %v109_v35 = vsub.f32 0.0, %v78_v15  ;;  %v108_v38 = vld [vmem:[#allocation2] sm:$0xff] }
  0xa8   :  { %s243_s4 = smov [#allocation4]  }
  0xa9   :  { %s145_s24 = sshll.u32 %s243_s4, 4  ;;  %s146_s24 = int_to_ptr.vmem [resolvable:$true] %s145_s24 }
  0xaa   :  { %s216_s25 = scalar_lea.vmem %s146_s24, 16  ;;  %s220_s26 = scalar_lea.vmem %s146_s24, 32 }
  0xab   :  { %p217_p5 = scmp.ne.s32.totalorder %s146_s24, %s216_s25  ;;  %p221_p6 = scmp.lt.s32.totalorder %s146_s24, %s146_s24 }
  0xac   :  { %p222_p7 = scmp.lt.s32.totalorder %s220_s26, %s216_s25 }
  0xae   :  { %p223_p8 = por %p222_p7, %p221_p6 }
  0xb0   :  { %p224_p9 = pnand %p223_p8, %p217_p5 }
 0x12a   :  { %v88_v26 = vpop.xlane.xlu1 %87 }
 0x12b   :  { %192 = vlog2.f32 %v88_v26 }
 0x12e   :  { %v98_v29 = vpop.xlane.xlu1 %97 }
 0x138   :  { %v193_v27 = vpop.eup %192 }
 0x139   :  { %v100_v28 = vmul.f32 0.6931472, %v193_v27 }
 0x13b   :  { %v101_v30 = vsub.f32 %v98_v29, %v100_v28 }
 0x13d   :  { %v102_v31 = vmul.f32 1.442695, %v101_v30 }
 0x13f   :  { %194 = vpow2.f32 %v102_v31 }
 0x14c   :  { %v195_v32 = vpop.eup %194 }
 0x14d   :  { %v104_v33 = vsub.f32 1.0, %v195_v32 }
 0x14f   :  { %v105_v34 = vmax.f32 %v104_v33, 0.0 }
 0x151   :  { %v106_v36 = vmul.f32 %v105_v34, %v105_v34 }
 0x153   :  { %v107_v37 = vmul.f32 %v106_v36, %v101_v30 }
 0x155   :  { %v110_v39 = vmul.f32 %v109_v35, %v107_v37 }
 0x157   :  { %v111_v40 = vadd.f32 %v110_v39, %v108_v38 }
 0x159   :  { %113 = vst.msk [vmem:[#allocation2] sm:$0xff] %vm73_vm2, %v111_v40 }
 0x160   :  { %v120_v41 = vld [vmem:[#allocation2] sm:$0xff] }
 0x161   :  { %v121_v42 = vsel %vm73_vm2, %v120_v41, 0.0 }
 0x162   :  { %v122_v43 = vrot.slane %v121_v42, 4 }
 0x164   :  { %v123_v44 = vadd.f32 %v122_v43, %v121_v42 }
 0x166   :  { %v124_v45 = vrot.slane %v123_v44, 2 }
 0x168   :  { %v125_v46 = vadd.f32 %v124_v45, %v123_v44 }
 0x16a   :  { %v126_v47 = vrot.slane %v125_v46, 1 }
 0x16c   :  { %v127_v48 = vadd.f32 %v126_v47, %v125_v46 }
 0x16e   :  { %129 = vst.msk [vmem:[#allocation4] sm:$0x1] %vm128_vm3, %v127_v48 }
 0x16f   :  { %227 = shalt.err (!%p224_p9)
}
 0x170   :  { %148 = dma.vmem_to_hbm [thread:$0]  %s146_s24, 16, %s298_s3, [#allocation5]  }
 0x171   :  { %236 = dma.done.wait [#allocation5], 16  }
 0x172   :  { %237 = vsyncadd [#allocation5], 4294967280 }
 0x173   :  { %238 = dma.done.wait [#allocation7], 16  }
 0x174   :  { %239 = vsyncadd [#allocation7], 4294967280 }
 0x175   :  { %165 = vsyncpa [#allocation5], 1 }
 0x176   :  { %166 = vsyncpa [#allocation7], 1 }

</bundles_post_ra>
